<compile_context>
chip_gen: v7x
topology: tpu7x:2x2x1
jax: 0.10.0
libtpu: 0.0.40
codegen_flags: <defaults>
</compile_context>

<pallas_src>
import jax
import jax.numpy as jnp
from jax import lax
from jax.experimental import pallas as pl
from jax.experimental.pallas import tpu as pltpu


def amesnet_kernel(x_ref,
                   w1_ref, b1_ref,
                   w2_ref, b2_ref,
                   w3_ref, b3_ref,
                   w4r_ref, b4_ref,
                   out_ref):
    # x tile: (TB, D) f32 straight from HBM; cast to bf16 on the VPU so the
    # MXU runs its bf16 path. All matmuls accumulate in f32.
    x = x_ref[...].astype(jnp.bfloat16)

    # fc1: D -> 128, ReLU   (Dropout == identity at inference)
    h1 = jnp.dot(x, w1_ref[...], preferred_element_type=jnp.float32)
    h1 = jnp.maximum(h1 + b1_ref[...], 0.0)

    # fc2: 128 -> 64, ReLU   (Dropout == identity at inference)
    h2 = jnp.dot(h1.astype(jnp.bfloat16), w2_ref[...],
                 preferred_element_type=jnp.float32)
    h2 = jnp.maximum(h2 + b2_ref[...], 0.0)

    # fc3: 64 -> 32, ReLU
    h3 = jnp.dot(h2.astype(jnp.bfloat16), w3_ref[...],
                 preferred_element_type=jnp.float32)
    h3 = jnp.maximum(h3 + b3_ref[...], 0.0)

    # fc4: 32 -> 1 as a transposed contraction: (1,32) . (TB,32)^T -> (1, TB).
    # Produces the lane-dense output row directly, no cross-lane relayout.
    h4 = lax.dot_general(w4r_ref[...], h3,
                         (((1,), (1,)), ((), ())),
                         preferred_element_type=jnp.float32)      # (1, TB)

    out_ref[...] = (h4 + b4_ref[0, 0]).astype(out_ref.dtype)


def _round_up(x, m):
    return ((x + m - 1) // m) * m


def _choose_tile_b(B, D):
    """Batch-tile size.

    - B <= 1024: one whole-array block (block == full dims -> always legal,
      zero host padding, one grid step).
    - B  > 1024: >= 2 tiles (feeds both TensorCores on v7x), each a multiple
      of 128 so the (1, TB) output block stays lane-dense/unmasked, capped so
      double-buffered f32 x + intermediates stay well under scoped VMEM on
      every generation (v7x: 32 MiB scoped / 64 MiB physical).
    """
    if B <= 1024:
        return B
    tb = 2048 if B > 4096 else _round_up(-(-B // 2), 128)
    budget = 20 << 20
    # per-row bytes: 2x f32 x (double-buffered) + bf16 x copy + f32/bf16 h1/h2/h3
    while tb > 256 and tb * (10 * D + 1536) > budget:
        tb //= 2
    return tb


def amesnet_forward(x, params):
    """x: (B, input_dim) float32. params: f32 dict, w_i (in, out), b_i (1, out)."""
    B, D = x.shape

    TB = _choose_tile_b(B, D)
    n_tiles = pl.cdiv(B, TB)

    # Weights to bf16 (tiny one-time cast); biases and w4 stay f32.
    w1 = params["w1"].astype(jnp.bfloat16)          # (D, 128), unpadded
    w2 = params["w2"].astype(jnp.bfloat16)          # (128, 64)
    w3 = params["w3"].astype(jnp.bfloat16)          # (64, 32)
    w4r = params["w4"].reshape(1, 32).astype(jnp.float32)
    b1, b2, b3 = params["b1"], params["b2"], params["b3"]
    b4 = params["b4"].reshape(1, 1).astype(jnp.float32)

    out = pl.pallas_call(
        amesnet_kernel,
        out_shape=jax.ShapeDtypeStruct((1, n_tiles * TB), jnp.float32),
        grid=(n_tiles,),
        in_specs=[
            pl.BlockSpec((TB, D), lambda i: (i, 0)),     # x: streamed per tile
            pl.BlockSpec((D, 128), lambda i: (0, 0)),    # w1 (VMEM-resident)
            pl.BlockSpec((1, 128), lambda i: (0, 0)),    # b1
            pl.BlockSpec((128, 64), lambda i: (0, 0)),   # w2
            pl.BlockSpec((1, 64), lambda i: (0, 0)),     # b2
            pl.BlockSpec((64, 32), lambda i: (0, 0)),    # w3
            pl.BlockSpec((1, 32), lambda i: (0, 0)),     # b3
            pl.BlockSpec((1, 32), lambda i: (0, 0)),     # w4 as a row
            pl.BlockSpec(memory_space=pltpu.MemorySpace.SMEM),  # b4 scalar
        ],
        out_specs=pl.BlockSpec((1, TB), lambda i: (0, i)),
        compiler_params=pltpu.CompilerParams(
            dimension_semantics=("parallel",),
            vmem_limit_bytes=32 * 1024 * 1024),
    )(x, w1, b1, w2, b2, w3, b3, w4r, b4)

    # Lane-dense (1, n_tiles*TB) slab -> (B, 1). Pure layout plumbing; rows
    # past B (ragged last tile) are garbage and dropped here.
    return out.reshape(-1)[:B].reshape(B, 1)


def init_params(key, input_dim):
    """Deterministic init mimicking nn.Linear default (U(-1/sqrt(in), 1/sqrt(in)))."""
    dims = [(input_dim, 128), (128, 64), (64, 32), (32, 1)]
    params = {}
    for i, (fan_in, fan_out) in enumerate(dims, start=1):
        key, kw, kb = jax.random.split(key, 3)
        bound = 1.0 / jnp.sqrt(jnp.float32(fan_in))
        params[f"w{i}"] = jax.random.uniform(
            kw, (fan_in, fan_out), jnp.float32, -bound, bound)
        params[f"b{i}"] = jax.random.uniform(
            kb, (1, fan_out), jnp.float32, -bound, bound)
    return params


def reference_forward_f32(x, params):
    h = x
    for i in range(1, 4):
        h = jnp.maximum(h @ params[f"w{i}"] + params[f"b{i}"], 0.0)
    return h @ params["w4"] + params["b4"]


def reference_forward_bf16_mirror(x, params):
    """Mirrors the kernel's quantization: bf16 matmul inputs, f32 accumulate."""
    f32 = jnp.float32
    xb = x.astype(jnp.bfloat16).astype(f32)
    w1 = params["w1"].astype(jnp.bfloat16).astype(f32)
    w2 = params["w2"].astype(jnp.bfloat16).astype(f32)
    w3 = params["w3"].astype(jnp.bfloat16).astype(f32)
    h1 = jnp.maximum(xb @ w1 + params["b1"], 0.0)
    h2 = jnp.maximum(h1.astype(jnp.bfloat16).astype(f32) @ w2 + params["b2"], 0.0)
    h3 = jnp.maximum(h2.astype(jnp.bfloat16).astype(f32) @ w3 + params["b3"], 0.0)
    return jnp.sum(h3 * params["w4"].reshape(1, 32), axis=-1,
                   keepdims=True) + params["b4"]


if __name__ == "__main__":
    key = jax.random.PRNGKey(0)
    B, input_dim = 8, 32
    k_x, k_p = jax.random.split(key)
    x = jax.random.normal(k_x, (B, input_dim), jnp.float32)
    params = init_params(k_p, input_dim)

    out = amesnet_forward(x, params)
    out = jax.block_until_ready(out)
    assert out.shape == (B, 1)

    # Tight check against a reference with matching bf16 quantization.
    ref_bf16 = reference_forward_bf16_mirror(x, params)
    assert jnp.allclose(out, ref_bf16, atol=2e-3, rtol=2e-3)

    # Loose sanity check against the pure-f32 reference.
    ref_f32 = reference_forward_f32(x, params)
    assert jnp.allclose(out, ref_f32, atol=1e-1, rtol=1e-1)

    print("KERNEL_OK")
</pallas_src>

<mosaic_0001>
module attributes {stable_mosaic.version = 11 : i64} {
  func.func @amesnet_kernel(%arg0: i32, %arg1: memref<8x32xf32, #tpu.memory_space<vmem>>, %arg2: memref<32x128xbf16, #tpu.memory_space<vmem>>, %arg3: memref<1x128xf32, #tpu.memory_space<vmem>>, %arg4: memref<128x64xbf16, #tpu.memory_space<vmem>>, %arg5: memref<1x64xf32, #tpu.memory_space<vmem>>, %arg6: memref<64x32xbf16, #tpu.memory_space<vmem>>, %arg7: memref<1x32xf32, #tpu.memory_space<vmem>>, %arg8: memref<1x32xf32, #tpu.memory_space<vmem>>, %arg9: memref<1x1xf32, #tpu.memory_space<smem>>, %arg10: memref<1x8xf32, #tpu.memory_space<vmem>>) attributes {dimension_semantics = [#tpu.dimension_semantics<parallel>], iteration_bounds = array<i64: 1>, scalar_prefetch = 0 : i64, scratch_operands = 0 : i64, tpu.core_type = #tpu.core_type<tc>, window_params = [{transform_indices = @transform_0, window_bounds = array<i64: 8, 32>}, {pipeline_mode = #tpu.pipeline_mode<synchronous>, transform_indices = @transform_1, window_bounds = array<i64: 32, 128>}, {pipeline_mode = #tpu.pipeline_mode<synchronous>, transform_indices = @transform_2, window_bounds = array<i64: 1, 128>}, {pipeline_mode = #tpu.pipeline_mode<synchronous>, transform_indices = @transform_3, window_bounds = array<i64: 128, 64>}, {pipeline_mode = #tpu.pipeline_mode<synchronous>, transform_indices = @transform_4, window_bounds = array<i64: 1, 64>}, {pipeline_mode = #tpu.pipeline_mode<synchronous>, transform_indices = @transform_5, window_bounds = array<i64: 64, 32>}, {pipeline_mode = #tpu.pipeline_mode<synchronous>, transform_indices = @transform_6, window_bounds = array<i64: 1, 32>}, {pipeline_mode = #tpu.pipeline_mode<synchronous>, transform_indices = @transform_7, window_bounds = array<i64: 1, 32>}, {transform_indices = @transform_8, window_bounds = array<i64: 1, 1>}, {transform_indices = @transform_9, window_bounds = array<i64: 1, 8>}]} {
    %c0 = arith.constant 0 : index
    %c0_0 = arith.constant 0 : index
    %0 = vector.load %arg1[%c0, %c0_0] : memref<8x32xf32, #tpu.memory_space<vmem>>, vector<8x32xf32>
    %1 = arith.truncf %0 : vector<8x32xf32> to vector<8x32xbf16>
    %c0_1 = arith.constant 0 : index
    %c0_2 = arith.constant 0 : index
    %2 = vector.load %arg2[%c0_1, %c0_2] : memref<32x128xbf16, #tpu.memory_space<vmem>>, vector<32x128xbf16>
    %cst = arith.constant dense<0.000000e+00> : vector<8x128xf32>
    %3 = tpu.matmul %1, %2, %cst {dimension_numbers = #tpu.dot_dimension_numbers<[1], [0], [0], [1], [0, 0, 1, 1], [], []>} : vector<8x32xbf16>, vector<32x128xbf16>, vector<8x128xf32> -> vector<8x128xf32>
    %c0_3 = arith.constant 0 : index
    %c0_4 = arith.constant 0 : index
    %4 = vector.load %arg3[%c0_3, %c0_4] : memref<1x128xf32, #tpu.memory_space<vmem>>, vector<1x128xf32>
    %5 = vector.broadcast %4 : vector<1x128xf32> to vector<8x128xf32>
    %6 = arith.addf %3, %5 : vector<8x128xf32>
    %cst_5 = arith.constant 0.000000e+00 : f32
    %7 = vector.broadcast %cst_5 : f32 to vector<8x128xf32>
    %8 = arith.maximumf %6, %7 : vector<8x128xf32>
    %9 = arith.truncf %8 : vector<8x128xf32> to vector<8x128xbf16>
    %c0_6 = arith.constant 0 : index
    %c0_7 = arith.constant 0 : index
    %10 = vector.load %arg4[%c0_6, %c0_7] : memref<128x64xbf16, #tpu.memory_space<vmem>>, vector<128x64xbf16>
    %cst_8 = arith.constant dense<0.000000e+00> : vector<8x64xf32>
    %11 = tpu.matmul %9, %10, %cst_8 {dimension_numbers = #tpu.dot_dimension_numbers<[1], [0], [0], [1], [0, 0, 1, 1], [], []>} : vector<8x128xbf16>, vector<128x64xbf16>, vector<8x64xf32> -> vector<8x64xf32>
    %c0_9 = arith.constant 0 : index
    %c0_10 = arith.constant 0 : index
    %12 = vector.load %arg5[%c0_9, %c0_10] : memref<1x64xf32, #tpu.memory_space<vmem>>, vector<1x64xf32>
    %13 = vector.broadcast %12 : vector<1x64xf32> to vector<8x64xf32>
    %14 = arith.addf %11, %13 : vector<8x64xf32>
    %cst_11 = arith.constant 0.000000e+00 : f32
    %15 = vector.broadcast %cst_11 : f32 to vector<8x64xf32>
    %16 = arith.maximumf %14, %15 : vector<8x64xf32>
    %17 = arith.truncf %16 : vector<8x64xf32> to vector<8x64xbf16>
    %c0_12 = arith.constant 0 : index
    %c0_13 = arith.constant 0 : index
    %18 = vector.load %arg6[%c0_12, %c0_13] : memref<64x32xbf16, #tpu.memory_space<vmem>>, vector<64x32xbf16>
    %cst_14 = arith.constant dense<0.000000e+00> : vector<8x32xf32>
    %19 = tpu.matmul %17, %18, %cst_14 {dimension_numbers = #tpu.dot_dimension_numbers<[1], [0], [0], [1], [0, 0, 1, 1], [], []>} : vector<8x64xbf16>, vector<64x32xbf16>, vector<8x32xf32> -> vector<8x32xf32>
    %c0_15 = arith.constant 0 : index
    %c0_16 = arith.constant 0 : index
    %20 = vector.load %arg7[%c0_15, %c0_16] : memref<1x32xf32, #tpu.memory_space<vmem>>, vector<1x32xf32>
    %21 = vector.broadcast %20 : vector<1x32xf32> to vector<8x32xf32>
    %22 = arith.addf %19, %21 : vector<8x32xf32>
    %cst_17 = arith.constant 0.000000e+00 : f32
    %23 = vector.broadcast %cst_17 : f32 to vector<8x32xf32>
    %24 = arith.maximumf %22, %23 : vector<8x32xf32>
    %c0_18 = arith.constant 0 : index
    %c0_19 = arith.constant 0 : index
    %25 = vector.load %arg8[%c0_18, %c0_19] : memref<1x32xf32, #tpu.memory_space<vmem>>, vector<1x32xf32>
    %cst_20 = arith.constant dense<0.000000e+00> : vector<1x8xf32>
    %26 = tpu.matmul %25, %24, %cst_20 {dimension_numbers = #tpu.dot_dimension_numbers<[1], [1], [0], [0], [0, 0, 1, 0], [], []>} : vector<1x32xf32>, vector<8x32xf32>, vector<1x8xf32> -> vector<1x8xf32>
    %c0_21 = arith.constant 0 : index
    %c0_22 = arith.constant 0 : index
    %27 = memref.load %arg9[%c0_21, %c0_22] : memref<1x1xf32, #tpu.memory_space<smem>>
    %28 = vector.broadcast %27 : f32 to vector<1x8xf32>
    %29 = arith.addf %26, %28 : vector<1x8xf32>
    %c0_23 = arith.constant 0 : index
    %c0_24 = arith.constant 0 : index
    %30 = vector.load %arg10[%c0_23, %c0_24] : memref<1x8xf32, #tpu.memory_space<vmem>>, vector<1x8xf32>
    tpu.vector_store %arg10[%c0_23, %c0_24], %29 {strides = array<i32>} : memref<1x8xf32, #tpu.memory_space<vmem>>, vector<1x8xf32>,
    return
  }
  func.func @transform_0(%arg0: i32) -> (i32, i32) {
    %c0_i32 = arith.constant 0 : i32
    %c0_i32_0 = arith.constant 0 : i32
    return %arg0, %c0_i32 : i32, i32
  }
  func.func @transform_1(%arg0: i32) -> (i32, i32) {
    %c0_i32 = arith.constant 0 : i32
    %c0_i32_0 = arith.constant 0 : i32
    %c0_i32_1 = arith.constant 0 : i32
    return %c0_i32, %c0_i32_0 : i32, i32
  }
  func.func @transform_2(%arg0: i32) -> (i32, i32) {
    %c0_i32 = arith.constant 0 : i32
    %c0_i32_0 = arith.constant 0 : i32
    %c0_i32_1 = arith.constant 0 : i32
    return %c0_i32, %c0_i32_0 : i32, i32
  }
  func.func @transform_3(%arg0: i32) -> (i32, i32) {
    %c0_i32 = arith.constant 0 : i32
    %c0_i32_0 = arith.constant 0 : i32
    %c0_i32_1 = arith.constant 0 : i32
    return %c0_i32, %c0_i32_0 : i32, i32
  }
  func.func @transform_4(%arg0: i32) -> (i32, i32) {
    %c0_i32 = arith.constant 0 : i32
    %c0_i32_0 = arith.constant 0 : i32
    %c0_i32_1 = arith.constant 0 : i32
    return %c0_i32, %c0_i32_0 : i32, i32
  }
  func.func @transform_5(%arg0: i32) -> (i32, i32) {
    %c0_i32 = arith.constant 0 : i32
    %c0_i32_0 = arith.constant 0 : i32
    %c0_i32_1 = arith.constant 0 : i32
    return %c0_i32, %c0_i32_0 : i32, i32
  }
  func.func @transform_6(%arg0: i32) -> (i32, i32) {
    %c0_i32 = arith.constant 0 : i32
    %c0_i32_0 = arith.constant 0 : i32
    %c0_i32_1 = arith.constant 0 : i32
    return %c0_i32, %c0_i32_0 : i32, i32
  }
  func.func @transform_7(%arg0: i32) -> (i32, i32) {
    %c0_i32 = arith.constant 0 : i32
    %c0_i32_0 = arith.constant 0 : i32
    %c0_i32_1 = arith.constant 0 : i32
    return %c0_i32, %c0_i32_0 : i32, i32
  }
  func.func @transform_8(%arg0: i32) -> (i32, i32) {
    %c0_i32 = arith.constant 0 : i32
    %c0_i32_0 = arith.constant 0 : i32
    %c0_i32_1 = arith.constant 0 : i32
    return %c0_i32, %c0_i32_0 : i32, i32
  }
  func.func @transform_9(%arg0: i32) -> (i32, i32) {
    %c0_i32 = arith.constant 0 : i32
    %c0_i32_0 = arith.constant 0 : i32
    return %c0_i32, %arg0 : i32, i32
  }
}

</mosaic_0001>

<bundles_post_ra>
// kernel: tpu_custom_call.1
= control target key start
LH: loop header
LB: loop body
LE: loop exit
PB: predicated region body
PF: predicated region fallthrough
CT: control target
= control target key end

     0   :  { %v524_v1 = vmov 0.0   ;;  %vm525_vm0 = vmmov 0   ;;  %vm60_vm1 = vcmask 261120   ;;  %s675_s0 = inlined_call_operand.vmem [shape: f32[8,32], index: 0, kind: input, shape index: {}]   ;;  %s676_s1 = inlined_call_operand.vmem [shape: bf16[32,128], index: 1, kind: input, shape index: {}]   ;;  %s677_s2 = inlined_call_operand.vmem [shape: f32[1,128], index: 2, kind: input, shape index: {}]   ;;  %s678_s3 = inlined_call_operand.vmem [shape: bf16[128,64], index: 3, kind: input, shape index: {}]   ;;  %s679_s4 = inlined_call_operand.vmem [shape: f32[1,64], index: 4, kind: input, shape index: {}]   ;;  %s680_s5 = inlined_call_operand.vmem [shape: bf16[64,32], index: 5, kind: input, shape index: {}]   ;;  %s681_s6 = inlined_call_operand.vmem [shape: f32[1,32], index: 6, kind: input, shape index: {}]   ;;  %s682_s7 = inlined_call_operand.vmem [shape: f32[1,32], index: 7, kind: input, shape index: {}]   ;;  %s683_s8 = inlined_call_operand.<no memory space> [shape: f32[1,1], index: 8, kind: input, shape index: {}]   ;;  %s684_s9 = inlined_call_operand.hbm [shape: f32[1,8], index: 9, kind: output, shape index: {}]  }
   0x1   :  { %v486_v0 = vld [vmem:[%s676_s1] sm:$0xff]   ;;  %438 = vmatprep.subr.bf16.mxu0 %v524_v1  ;;  %v487_v2 = vld [vmem:[%s676_s1 + $0x8] sm:$0xff]   ;;  %446 = vmatprep.subr.bf16.mxu1 %v524_v1  ;;  %v490_v7 = vld [vmem:[%s678_s3 + $0x10] sm:$0xff]  }
   0x2   :  { %439 = vmatpush3.bf16.msra.mxu0 %v486_v0  ;;  %442 = vmatprep.mubr.msk.bf16.mxu0 %vm525_vm0, %v524_v1  ;;  %v35_v3 = vld [vmem:[%s675_s0] sm:$0xff]  ;;  %v489_v6 = vld [vmem:[%s678_s3 + $0x8] sm:$0xff]  }
   0x3   :  { %440 = vmatprep.subr.bf16.mxu0 %v524_v1  ;;  %v488_v4 = vld [vmem:[%s678_s3] sm:$0xff]   ;;  %462 = vmatprep.mubr.msk.bf16.mxu1 %vm525_vm0, %v524_v1  ;;  %v36_v5 = vpack.c.bf16 %v35_v3, %v35_v3 }
   0x4   :  { %447 = vmatpush3.bf16.msra.mxu1 %v488_v4 }
   0x5   :  { %448 = vmatprep.subr.bf16.mxu1 %v524_v1 }
   0x6   :  { %441 = vmatpush3.bf16.msra.mxu0 %v487_v2 }
   0x7   :  { %466 = vmatprep.subr.bf16.mxu0 %v524_v1 }
   0x8   :  { %449 = vmatpush3.bf16.msra.mxu1 %v489_v6 }
   0x9   :  { %443 = vmatmul.mubr.msk.bf16.vlgmr.msra.gmra.mrb[0].mxu0 %vm60_vm1, %v36_v5  ;;  %450 = vmatprep.subr.bf16.mxu1 %v524_v1 }
   0xa   :  { %474 = vmatprep.mubr.msk.bf16.mxu0 %vm525_vm0, %v524_v1 }
   0xb   :  { %15 = vsyncpa [#allocation4], 0  ;;  %v491_v8 = vld [vmem:[%s678_s3 + $0x18] sm:$0xff]   ;;  %v492_v9 = vld [vmem:[%s678_s3 + $0x20] sm:$0xff]   ;;  %vm258_vm2 = vcmask 523264   ;;  %v305_v41 = vstv %s683_s8  ;;  %s526_s20 = smov [#allocation3]  }
   0xc   :  { %451 = vmatpush3.bf16.msra.mxu1 %v490_v7  ;;  %v493_v10 = vld [vmem:[%s678_s3 + $0x28] sm:$0xff]   ;;  %v494_v11 = vld [vmem:[%s678_s3 + $0x30] sm:$0xff]   ;;  %v495_v12 = vld [vmem:[%s678_s3 + $0x38] sm:$0xff]   ;;  %vm382_vm3 = vcmask 57344  }
   0xd   :  { %452 = vmatprep.subr.bf16.mxu1 %v524_v1  ;;  %v496_v13 = vld [vmem:[%s680_s5] sm:$0xff]   ;;  %v497_v14 = vld [vmem:[%s680_s5 + $0x8] sm:$0xff]   ;;  %v498_v23 = vld [vmem:[%s680_s5 + $0x10] sm:$0xff]  }
   0xe   :  { %467 = vmatpush3.bf16.msra.mxu0 %v496_v13  ;;  %v398_v15 = vld [vmem:[%s677_s2] ss:$0 sm:$0xff]  ;;  %v499_v24 = vld [vmem:[%s680_s5 + $0x18] sm:$0xff]  }
   0xf   :  { %468 = vmatprep.subr.bf16.mxu0 %v524_v1  ;;  %v402_v25 = vld [vmem:[%s679_s4] ss:$0 sm:$0xff] }
  0x10   :  { %453 = vmatpush3.bf16.msra.mxu1 %v491_v8  ;;  %v411_v33 = vld [vmem:[%s681_s6] ss:$0 sm:$0xff]  ;;  %s390_s6 = sshll.u32 %s526_s20, 4  ;;  %s391_s6 = int_to_ptr.vmem [resolvable:$true] %s390_s6 }
  0x11   :  { %454 = vmatprep.subr.bf16.mxu1 %v524_v1  ;;  %v303_v40 = vld [vmem:[%s682_s7] sm:$0x1]  ;;  %s500_s21 = scalar_lea.vmem %s391_s6, 16  ;;  %s504_s22 = scalar_lea.vmem %s391_s6, 32 }
  0x12   :  { %469 = vmatpush3.bf16.msra.mxu0 %v497_v14  ;;  %p501_p0 = scmp.ne.s32.totalorder %s391_s6, %s500_s21  ;;  %p505_p1 = scmp.lt.s32.totalorder %s391_s6, %s391_s6 }
  0x13   :  { %470 = vmatprep.subr.bf16.mxu0 %v524_v1  ;;  %p506_p2 = scmp.lt.s32.totalorder %s504_s22, %s500_s21 }
  0x14   :  { %455 = vmatpush3.bf16.msra.mxu1 %v492_v9 }
  0x15   :  { %456 = vmatprep.subr.bf16.mxu1 %v524_v1  ;;  %p507_p3 = por %p506_p2, %p505_p1 }
  0x16   :  { %471 = vmatpush3.bf16.msra.mxu0 %v498_v23 }
  0x17   :  { %472 = vmatprep.subr.bf16.mxu0 %v524_v1  ;;  %p508_p4 = pnand %p507_p3, %p501_p0 }
  0x18   :  { %457 = vmatpush3.bf16.msra.mxu1 %v493_v10 }
  0x19   :  { %458 = vmatprep.subr.bf16.mxu1 %v524_v1 }
  0x1a   :  { %473 = vmatpush3.bf16.msra.mxu0 %v499_v24 }
  0x1b   :  { %478 = vmatprep.subr.mxu0 %v524_v1 }
  0x1c   :  { %459 = vmatpush3.bf16.msra.mxu1 %v494_v11 }
  0x1d   :  { %460 = vmatprep.subr.bf16.mxu1 %v524_v1 }
  0x20   :  { %461 = vmatpush3.bf16.msra.mxu1 %v495_v12 }
  0xdc   :  { %v98_v16 = vpop.f32.mrb[0].mxu0 }
  0xdd   :  { %v99_v17 = vadd.f32 %v398_v15, %v98_v16  ;;  %v444_v18 = vpop.f32.mrb[1].mxu0 }
  0xde   :  { %v101_v19 = vpop.f32.mrb[2].mxu0 }
  0xdf   :  { %v104_v20 = vmax.f32 %v99_v17, 0.0  ;;  %v445_v21 = vpop.f32.mrb[3].mxu0 }
  0xe1   :  { %v105_v22 = vpack.c.bf16 %v104_v20, %v104_v20 }
  0xe3   :  { %463 = vmatmul.mubr.bf16.vlgmr.msra.gmra.mrb[0].mxu1 %v105_v22 }
 0x1b6   :  { %v211_v26 = vpop.f32.mrb[0].mxu1 }
 0x1b7   :  { %v212_v27 = vadd.f32 %v402_v25, %v211_v26  ;;  %v464_v28 = vpop.f32.mrb[1].mxu1 }
 0x1b8   :  { %v214_v29 = vpop.f32.mrb[2].mxu1 }
 0x1b9   :  { %v217_v30 = vmax.f32 %v212_v27, 0.0  ;;  %v465_v31 = vpop.f32.mrb[3].mxu1 }
 0x1bb   :  { %v218_v32 = vpack.c.bf16 %v217_v30, %v217_v30 }
 0x1bd   :  { %475 = vmatmul.mubr.msk.bf16.vlgmr.msra.gmra.mrb[4].mxu0 %vm258_vm2, %v218_v32 }
 0x1be   :  { %480 = vmatprep.mubr.msk.f32.mxu0 %vm525_vm0, %v524_v1 }
 0x290   :  { %v296_v34 = vpop.f32.mrb[4].mxu0 }
 0x291   :  { %v297_v35 = vadd.f32 %v411_v33, %v296_v34  ;;  %v476_v36 = vpop.f32.mrb[5].mxu0 }
 0x292   :  { %v299_v37 = vpop.f32.mrb[6].mxu0 }
 0x293   :  { %v302_v38 = vmax.f32 %v297_v35, 0.0  ;;  %v477_v39 = vpop.f32.mrb[7].mxu0 }
 0x295   :  { %479 = vmatpush3.xpose.msk.msra.mxu0 %vm60_vm1, %v302_v38 }
 0x298   :  { %481 = vmatmul.mubr.msk.f32.vlgmr.msra.gmra.mrb[8].mxu0 %vm60_vm1, %v303_v40 }
 0x36b   :  { %v378_v42 = vpop.f32.mrb[8].mxu0 }
 0x36c   :  { %v379_v43 = vadd.f32 %v378_v42, %v305_v41  ;;  %v482_v44 = vpop.f32.mrb[9].mxu0 }
 0x36e   :  { %383 = vst.msk [vmem:[#allocation3] sm:$0x1] %vm382_vm3, %v379_v43 }
 0x36f   :  { %511 = shalt.err (!%p508_p4)
}
 0x370   :  { %s512_s8 = scalar_lea.hbm %s684_s9, 16 }
 0x371   :  { %p513_p5 = scmp.ne.s32.totalorder %s684_s9, %s512_s8  ;;  %p516_p6 = scmp.lt.u32.totalorder %s512_s8, %s684_s9 }
 0x373   :  { %p518_p7 = pnand %p516_p6, %p513_p5 }
 0x375   :  { %521 = shalt.err (!%p518_p7)
}
 0x376   :  { %393 = dma.vmem_to_hbm [thread:$0]  %s391_s6, 16, %s684_s9, [#allocation4]  }
 0x377   :  { %522 = dma.done.wait [#allocation4], 16  }
 0x378   :  { %523 = vsyncadd [#allocation4], 4294967280 }
 0x379   :  { %397 = vsyncpa [#allocation4], 1 }

</bundles_post_ra>
